<compile_context>
chip_gen: v6e
topology: v6e:2x2x1
jax: 0.10.0
libtpu: 0.0.40
codegen_flags: <defaults>
</compile_context>

<pallas_src>
import math

import jax
import jax.numpy as jnp
import numpy as np
from jax.experimental import pallas as pl
from jax.experimental.pallas import tpu as pltpu

# ----------------------------- model hyperparams -----------------------------
VOCAB = 128        # vocab rows in the (synthetic) GloVe table
EMB_DIM = 32       # token_emb_dim == GNB "features"
SEQ = 16           # n_ctx
LABEL_SIZE = 8     # GNB "classes"
C_PAD = 128        # class axis padded to a full lane width
BATCH = 16         # example batch streamed through the grid
TB = 8             # batch rows per grid step (multiple of 8 sublanes)
LOG_2PI = math.log(2.0 * math.pi)


def gnb_kernel(ids_ref, emb_ref, prec_t_ref, mu_prec_t_ref, bias_ref, o_ref):
    """Per grid step:
       ids:   (TB*SEQ, 1) i32   token ids for TB batch rows
       emb:   (V, E)            GloVe table (VMEM-resident, constant block)
       prec_t / mu_prec_t: (E, C_PAD)   precomputed GNB params (padded)
       bias:  (1, C_PAD)        fused log_prior + Gaussian constants (padded)
       o:     (TB, C_PAD)       lane-dense class scores
    """
    tokens = ids_ref.shape[0]                 # TB * SEQ
    v = emb_ref.shape[0]
    tb = o_ref.shape[0]

    # ---- embedding lookup fused as a one-hot matmul on the MXU ----
    col = jax.lax.broadcasted_iota(jnp.int32, (tokens, v), 1)
    onehot = (ids_ref[...] == col).astype(jnp.float32)              # (TB*S, V)
    emb = jnp.dot(onehot, emb_ref[...],
                  preferred_element_type=jnp.float32)               # (TB*S, E)

    # ---- max over the sequence dim (dropout = identity in eval) ----
    x = emb.reshape(tb, SEQ, EMB_DIM).max(axis=1)                   # (TB, E)

    # ---- Gaussian Naive Bayes head (param-only math hoisted to init) ----
    quad = jnp.dot(x * x, prec_t_ref[...],
                   preferred_element_type=jnp.float32)              # (TB, C_PAD)
    xmu = jnp.dot(x, mu_prec_t_ref[...],
                  preferred_element_type=jnp.float32)               # (TB, C_PAD)
    o_ref[...] = bias_ref[...] - 0.5 * quad + xmu


def text_glove_gnb_forward(token_ids, params):
    """token_ids: (B, S) int32. Returns (B, LABEL_SIZE) f32 class scores."""
    B, S = token_ids.shape
    assert S == SEQ and B % TB == 0
    ids2d = token_ids.reshape(B * S, 1).astype(jnp.int32)
    grid = (B // TB,)
    tokens_per_step = TB * SEQ

    cost = pl.CostEstimate(
        flops=2 * B * SEQ * VOCAB * EMB_DIM + 4 * B * EMB_DIM * C_PAD,
        transcendentals=0,
        bytes_accessed=(ids2d.size * 4 + VOCAB * EMB_DIM * 4
                        + 2 * EMB_DIM * C_PAD * 4 + C_PAD * 4 + B * C_PAD * 4),
    )

    out_pad = pl.pallas_call(
        gnb_kernel,
        out_shape=jax.ShapeDtypeStruct((B, C_PAD), jnp.float32),
        grid=grid,
        in_specs=[
            pl.BlockSpec((tokens_per_step, 1), lambda i: (i, 0)),       # ids tile
            pl.BlockSpec((VOCAB, EMB_DIM), lambda i: (0, 0)),           # emb (resident)
            pl.BlockSpec((EMB_DIM, C_PAD), lambda i: (0, 0)),           # prec_t
            pl.BlockSpec((EMB_DIM, C_PAD), lambda i: (0, 0)),           # mu*prec_t
            pl.BlockSpec((1, C_PAD), lambda i: (0, 0)),                 # fused bias
        ],
        out_specs=pl.BlockSpec((TB, C_PAD), lambda i: (i, 0)),
        compiler_params=pltpu.CompilerParams(
            dimension_semantics=("parallel",)),
        cost_estimate=cost,
    )(ids2d, params["emb_table"], params["gnb_prec_t"],
      params["gnb_mu_prec_t"], params["gnb_bias"])
    return out_pad[:, :LABEL_SIZE]


def _precompute_gnb_head(mu, log_var, log_prior):
    """Hoist all parameter-only math to weight-load time (padded to C_PAD)."""
    prec = jnp.exp(-log_var)                                        # (C, E)
    mu_prec = mu * prec                                             # (C, E)
    bias = log_prior - 0.5 * (jnp.sum(log_var + mu * mu_prec, axis=1)
                              + EMB_DIM * LOG_2PI)                  # (C,)
    C = mu.shape[0]
    prec_t = jnp.zeros((EMB_DIM, C_PAD), jnp.float32).at[:, :C].set(prec.T)
    mu_prec_t = jnp.zeros((EMB_DIM, C_PAD), jnp.float32).at[:, :C].set(mu_prec.T)
    bias_p = jnp.zeros((1, C_PAD), jnp.float32).at[0, :C].set(bias)
    return prec_t, mu_prec_t, bias_p


def init_params(key):
    """Deterministic synthetic weights matching the PyTorch module's shapes."""
    k = jax.random.split(key, 4)
    p = {}
    emb = jax.random.normal(k[0], (VOCAB, EMB_DIM), jnp.float32) * 0.5
    emb = emb.at[0].set(0.0)  # padding_idx=0 row, as in nn.Embedding
    p["emb_table"] = emb
    p["gnb_mu"] = jax.random.normal(k[1], (LABEL_SIZE, EMB_DIM), jnp.float32) * 0.5
    p["gnb_log_var"] = jax.random.normal(k[2], (LABEL_SIZE, EMB_DIM),
                                         jnp.float32) * 0.1
    p["gnb_log_prior"] = jax.random.normal(k[3], (LABEL_SIZE,), jnp.float32) * 0.1
    # Parameter-only math done once at load time, not per call.
    prec_t, mu_prec_t, bias = _precompute_gnb_head(
        p["gnb_mu"], p["gnb_log_var"], p["gnb_log_prior"])
    p["gnb_prec_t"] = prec_t
    p["gnb_mu_prec_t"] = mu_prec_t
    p["gnb_bias"] = bias
    return p


def reference_forward(token_ids, p):
    """Pure-JAX reference mirroring the PyTorch forward (eval mode)."""
    emb = p["emb_table"][token_ids]                     # (B, S, E)
    x = jnp.max(emb, axis=1)                            # (B, E) == embedded.max(1)
    mu = p["gnb_mu"]                                    # (C, E)
    lv = p["gnb_log_var"]                               # (C, E)
    diff = x[:, None, :] - mu[None, :, :]               # (B, C, E)
    log_lik = -0.5 * jnp.sum(LOG_2PI + lv[None] + diff * diff / jnp.exp(lv)[None],
                             axis=-1)                   # (B, C)
    return p["gnb_log_prior"][None, :] + log_lik


if __name__ == "__main__":
    key = jax.random.PRNGKey(0)
    pkey, xkey = jax.random.split(key)
    params = init_params(pkey)
    token_ids = jax.random.randint(xkey, (BATCH, SEQ), 0, VOCAB, dtype=jnp.int32)

    out = jax.block_until_ready(text_glove_gnb_forward(token_ids, params))
    ref = reference_forward(token_ids, params)

    assert out.shape == (BATCH, LABEL_SIZE)
    np.testing.assert_allclose(np.asarray(out), np.asarray(ref),
                               rtol=1e-3, atol=1e-3)
    print("KERNEL_OK")
</pallas_src>

<mosaic_0001>
module attributes {stable_mosaic.version = 11 : i64} {
  func.func @gnb_kernel(%arg0: i32, %arg1: memref<128x1xi32, #tpu.memory_space<vmem>>, %arg2: memref<128x32xf32, #tpu.memory_space<vmem>>, %arg3: memref<32x128xf32, #tpu.memory_space<vmem>>, %arg4: memref<32x128xf32, #tpu.memory_space<vmem>>, %arg5: memref<1x128xf32, #tpu.memory_space<vmem>>, %arg6: memref<8x128xf32, #tpu.memory_space<vmem>>) attributes {dimension_semantics = [#tpu.dimension_semantics<parallel>], iteration_bounds = array<i64: 2>, scalar_prefetch = 0 : i64, scratch_operands = 0 : i64, tpu.core_type = #tpu.core_type<tc>, window_params = [{transform_indices = @transform_0, window_bounds = array<i64: 128, 1>}, {pipeline_mode = #tpu.pipeline_mode<synchronous>, transform_indices = @transform_1, window_bounds = array<i64: 128, 32>}, {pipeline_mode = #tpu.pipeline_mode<synchronous>, transform_indices = @transform_2, window_bounds = array<i64: 32, 128>}, {pipeline_mode = #tpu.pipeline_mode<synchronous>, transform_indices = @transform_3, window_bounds = array<i64: 32, 128>}, {pipeline_mode = #tpu.pipeline_mode<synchronous>, transform_indices = @transform_4, window_bounds = array<i64: 1, 128>}, {transform_indices = @transform_5, window_bounds = array<i64: 8, 128>}]} {
    %0 = tpu.iota {dimensions = array<i32: 1>} : vector<128x128xi32>
    %c0 = arith.constant 0 : index
    %c0_0 = arith.constant 0 : index
    %1 = vector.load %arg1[%c0, %c0_0] : memref<128x1xi32, #tpu.memory_space<vmem>>, vector<128x1xi32>
    %2 = vector.broadcast %1 : vector<128x1xi32> to vector<128x128xi32>
    %3 = arith.cmpi eq, %2, %0 : vector<128x128xi32>
    %4 = arith.extui %3 : vector<128x128xi1> to vector<128x128xi32>
    %5 = arith.sitofp %4 : vector<128x128xi32> to vector<128x128xf32>
    %c0_1 = arith.constant 0 : index
    %c0_2 = arith.constant 0 : index
    %6 = vector.load %arg2[%c0_1, %c0_2] : memref<128x32xf32, #tpu.memory_space<vmem>>, vector<128x32xf32>
    %cst = arith.constant dense<0.000000e+00> : vector<128x32xf32>
    %7 = tpu.matmul %5, %6, %cst {dimension_numbers = #tpu.dot_dimension_numbers<[1], [0], [0], [1], [0, 0, 1, 1], [], []>} : vector<128x128xf32>, vector<128x32xf32>, vector<128x32xf32> -> vector<128x32xf32>
    %8 = vector.shape_cast %7 : vector<128x32xf32> to vector<8x16x32xf32>
    %cst_3 = arith.constant dense<0xFF800000> : vector<8x32xf32>
    %9 = vector.multi_reduction <maximumf>, %8, %cst_3 [1] : vector<8x16x32xf32> to vector<8x32xf32>
    %10 = arith.mulf %9, %9 : vector<8x32xf32>
    %c0_4 = arith.constant 0 : index
    %c0_5 = arith.constant 0 : index
    %11 = vector.load %arg3[%c0_4, %c0_5] : memref<32x128xf32, #tpu.memory_space<vmem>>, vector<32x128xf32>
    %cst_6 = arith.constant dense<0.000000e+00> : vector<8x128xf32>
    %12 = tpu.matmul %10, %11, %cst_6 {dimension_numbers = #tpu.dot_dimension_numbers<[1], [0], [0], [1], [0, 0, 1, 1], [], []>} : vector<8x32xf32>, vector<32x128xf32>, vector<8x128xf32> -> vector<8x128xf32>
    %c0_7 = arith.constant 0 : index
    %c0_8 = arith.constant 0 : index
    %13 = vector.load %arg4[%c0_7, %c0_8] : memref<32x128xf32, #tpu.memory_space<vmem>>, vector<32x128xf32>
    %cst_9 = arith.constant dense<0.000000e+00> : vector<8x128xf32>
    %14 = tpu.matmul %9, %13, %cst_9 {dimension_numbers = #tpu.dot_dimension_numbers<[1], [0], [0], [1], [0, 0, 1, 1], [], []>} : vector<8x32xf32>, vector<32x128xf32>, vector<8x128xf32> -> vector<8x128xf32>
    %c0_10 = arith.constant 0 : index
    %c0_11 = arith.constant 0 : index
    %15 = vector.load %arg5[%c0_10, %c0_11] : memref<1x128xf32, #tpu.memory_space<vmem>>, vector<1x128xf32>
    %cst_12 = arith.constant 5.000000e-01 : f32
    %16 = vector.broadcast %cst_12 : f32 to vector<8x128xf32>
    %17 = arith.mulf %16, %12 : vector<8x128xf32>
    %18 = vector.broadcast %15 : vector<1x128xf32> to vector<8x128xf32>
    %19 = arith.subf %18, %17 : vector<8x128xf32>
    %20 = arith.addf %19, %14 : vector<8x128xf32>
    %c0_13 = arith.constant 0 : index
    %c0_14 = arith.constant 0 : index
    %21 = vector.load %arg6[%c0_13, %c0_14] : memref<8x128xf32, #tpu.memory_space<vmem>>, vector<8x128xf32>
    tpu.vector_store %arg6[%c0_13, %c0_14], %20 {strides = array<i32>} : memref<8x128xf32, #tpu.memory_space<vmem>>, vector<8x128xf32>,
    return
  }
  func.func @transform_0(%arg0: i32) -> (i32, i32) {
    %c0_i32 = arith.constant 0 : i32
    %c0_i32_0 = arith.constant 0 : i32
    return %arg0, %c0_i32 : i32, i32
  }
  func.func @transform_1(%arg0: i32) -> (i32, i32) {
    %c0_i32 = arith.constant 0 : i32
    %c0_i32_0 = arith.constant 0 : i32
    %c0_i32_1 = arith.constant 0 : i32
    return %c0_i32, %c0_i32_0 : i32, i32
  }
  func.func @transform_2(%arg0: i32) -> (i32, i32) {
    %c0_i32 = arith.constant 0 : i32
    %c0_i32_0 = arith.constant 0 : i32
    %c0_i32_1 = arith.constant 0 : i32
    return %c0_i32, %c0_i32_0 : i32, i32
  }
  func.func @transform_3(%arg0: i32) -> (i32, i32) {
    %c0_i32 = arith.constant 0 : i32
    %c0_i32_0 = arith.constant 0 : i32
    %c0_i32_1 = arith.constant 0 : i32
    return %c0_i32, %c0_i32_0 : i32, i32
  }
  func.func @transform_4(%arg0: i32) -> (i32, i32) {
    %c0_i32 = arith.constant 0 : i32
    %c0_i32_0 = arith.constant 0 : i32
    %c0_i32_1 = arith.constant 0 : i32
    return %c0_i32, %c0_i32_0 : i32, i32
  }
  func.func @transform_5(%arg0: i32) -> (i32, i32) {
    %c0_i32 = arith.constant 0 : i32
    %c0_i32_0 = arith.constant 0 : i32
    return %arg0, %c0_i32 : i32, i32
  }
}

</mosaic_0001>

<bundles_post_ra>
// kernel: tpu_custom_call.1
= control target key start
LH: loop header
LB: loop body
LE: loop exit
PB: predicated region body
PF: predicated region fallthrough
CT: control target
= control target key end

     0   :  { %10 = vsyncpa [#allocation3], 0  ;;  %s1423_s0 = inlined_call_operand.vmem [shape: s32[256,1], index: 0, kind: input, shape index: {}]   ;;  %s1424_s1 = inlined_call_operand.vmem [shape: f32[128,32], index: 1, kind: input, shape index: {}]   ;;  %s1425_s2 = inlined_call_operand.vmem [shape: f32[32,128], index: 2, kind: input, shape index: {}]   ;;  %s1426_s3 = inlined_call_operand.vmem [shape: f32[32,128], index: 3, kind: input, shape index: {}]   ;;  %s1427_s4 = inlined_call_operand.vmem [shape: f32[1,128], index: 4, kind: input, shape index: {}]   ;;  %s1428_s5 = inlined_call_operand.hbm [shape: f32[16,128], index: 5, kind: output, shape index: {}]  }
   0x1   :  { %12 = vsyncpa [#allocation3 + $0x1], 0  ;;  %s1194_s18 = smov 0   ;;  %s1196_s19 = smov 0  }
   0x2   :  { %s1198_s20 = smov 0   ;;  %s1200_s21 = smov 0  }
   0x3 LB: > { %s1215_s22 = sadd.s32 4294967295, %s1157_s21   ;;  %s854_s23 = sadd.s32 4294967294, %s1157_s21   ;;  %s1157_s21 = sphi %s1200_s21, %s1434_s21   ;;  %s1153_s20 = sphi %s1198_s20, %s1433_s20   ;;  %s1149_s19 = sphi %s1196_s19, %s1432_s19   ;;  %s1145_s18 = sphi %s1194_s18, %s1431_s18  }
   0x4   : > { %s1219_s24 = sadd.s32 1, %s1157_s21   ;;  %s135_s25 = sadd.s32 1, %s1153_s20 }
   0x5   : > { %s132_s26 = ssub.s32 %s1157_s21, %s1219_s24  ;;  %p145_p0 = scmp.ne.s32.totalorder %s1153_s20, %s1149_s19 }
   0x6   : > { %p133_p1 = scmp.eq.s32.totalorder %s132_s26, 0  ;;  %p146_p2 = scmp.eq.s32.totalorder %s1215_s22, 1 }
   0x7   : > { %p151_p3 = scmp.ne.s32.totalorder %s1149_s19, %s1145_s18  ;;  %p152_p4 = scmp.eq.s32.totalorder %s854_s23, 1 }
   0x8   : > { %s1230_s27 = scalar_select %p133_p1, %s1153_s20, %s135_s25  }
   0x9   : > { %p1232_p5 = por %p146_p2, %p145_p0  ;;  %p1236_p6 = por %p152_p4, %p151_p3 }
   0xa   : > { %p857_p7 = scmp.ge.s32.totalorder %s1157_s21, 1  ;;  %p191_p8 = scmp.lt.s32.totalorder %s1157_s21, 3 }
   0xc   : > { %p192_p9 = pnand %p857_p7, %p191_p8 }
   0xd   : > { %s859_s30 = sshll.u32 (!%p192_p9), %s1215_s22, 4  ;;  %s897_s14 = sshll.u32 (!%p192_p9), %s1215_s22, 7 }
   0xe   : > { %195 = sbr.rel (%p192_p9) target bundleno = 610 (0x262), region = 40  ;;  %p220_p10 = scmp.lt.s32.totalorder (!%p192_p9), %s859_s30, 31 }
   0xf   : > { %s1388_s26 = scalar_lea.hbm (!%p192_p9), %s1428_s5, %s897_s14  ;;  %s1163_s22 = smov (!%p192_p9), [#allocation2]  }
  0x10   : > { %s1101_s7 = sshll.u32 (!%p192_p9), %s1163_s22, 4  ;;  %s1102_s7 = int_to_ptr.vmem [resolvable:$false] %s1101_s7 }
  0x11   : > { %s1103_s8 = scalar_lea.vmem (!%p192_p9), %s1102_s7, 256 }
  0x13   : > { %v354_v0 = vld [vmem:[%s1424_s1 + $0x78] sm:$0xff]  ;;  %v1159_v1 = vmov 0   ;;  %v353_v2 = vld [vmem:[%s1424_s1 + $0x70] sm:$0xff]  ;;  %s1436_s30 = smov (!%p220_p10, %s859_s30), 31  ;;  %v352_v3 = vld [vmem:[%s1424_s1 + $0x68] sm:$0xff]  ;;  %v225_v33 = vlaneseq  ;;  %v1160_v37 = vmov 1.0  }
  0x14   : > { %1096 = vset.pattern.permute.xlu1 %v1159_v1  ;;  %1095 = vset.pattern.permute.xlu0 %v1159_v1  ;;  %s860_s12 = sshll.u32 %s1436_s30, 3  ;;  %v351_v4 = vld [vmem:[%s1424_s1 + $0x60] sm:$0xff]  ;;  %v350_v7 = vld [vmem:[%s1424_s1 + $0x58] sm:$0xff]  ;;  %v349_v10 = vld [vmem:[%s1424_s1 + $0x50] sm:$0xff]  ;;  %v1161_v52 = vmov 0.0  }
  0x15   : > { %942 = vmatprep.subr.mxu0 %v354_v0  ;;  %1020 = vmatprep.subr.mxu1 %v354_v0  ;;  %s1255_s15 = scalar_lea.vmem %s1423_s0, %s860_s12  ;;  %v348_v13 = vld [vmem:[%s1424_s1 + $0x48] sm:$0xff]  ;;  %v347_v14 = vld [vmem:[%s1424_s1 + $0x40] sm:$0xff]  ;;  %v346_v17 = vld [vmem:[%s1424_s1 + $0x38] sm:$0xff]  ;;  %v226_v34 = vand.u32 127, %v225_v33 }
  0x16   : > { %943 = vmatpush3.msra.mxu0 %v354_v0  ;;  %1036 = vmatpush3.msra.mxu1 %v354_v0  ;;  %v229_v5 = vld [vmem:[%s1255_s15 + $0x10] sm:$0xff]  ;;  %v227_v6 = vld [vmem:[%s1255_s15] sm:$0xff]  ;;  %v230_v8 = vld [vmem:[%s1255_s15 + $0x18] sm:$0xff] }
  0x17   : > { %944 = vmatprep.subr.mxu0 %v353_v2  ;;  %1021 = vmatprep.subr.mxu1 %v353_v2  ;;  %v228_v9 = vld [vmem:[%s1255_s15 + $0x8] sm:$0xff]  ;;  %v231_v12 = vld [vmem:[%s1255_s15 + $0x20] sm:$0xff]  ;;  %v234_v15 = vld [vmem:[%s1255_s15 + $0x38] sm:$0xff] }
  0x18   : > { %945 = vmatpush3.msra.mxu0 %v353_v2  ;;  %1037 = vmatpush3.msra.mxu1 %v353_v2  ;;  %v232_v11 = vld [vmem:[%s1255_s15 + $0x28] sm:$0xff]  ;;  %v233_v16 = vld [vmem:[%s1255_s15 + $0x30] sm:$0xff]  ;;  %v235_v19 = vld [vmem:[%s1255_s15 + $0x40] sm:$0xff] }
  0x19   : > { %946 = vmatprep.subr.mxu0 %v352_v3  ;;  %1022 = vmatprep.subr.mxu1 %v352_v3  ;;  %v236_v18 = vld [vmem:[%s1255_s15 + $0x48] sm:$0xff]  ;;  %v345_v20 = vld [vmem:[%s1424_s1 + $0x30] sm:$0xff]  ;;  %v239_v23 = vld [vmem:[%s1255_s15 + $0x60] sm:$0xff] }
  0x1a   : > { %947 = vmatpush3.msra.mxu0 %v352_v3  ;;  %1038 = vmatpush3.msra.mxu1 %v352_v3  ;;  %v344_v21 = vld [vmem:[%s1424_s1 + $0x28] sm:$0xff]  ;;  %v343_v24 = vld [vmem:[%s1424_s1 + $0x20] sm:$0xff]  ;;  %v238_v25 = vld [vmem:[%s1255_s15 + $0x58] sm:$0xff] }
  0x1b   : > { %250 = vperm.xlu1 %1096, %v229_v5   ;;  %244 = vperm.xlu0 %1095, %v227_v6   ;;  %v240_v22 = vld [vmem:[%s1255_s15 + $0x68] sm:$0xff]  ;;  %v237_v26 = vld [vmem:[%s1255_s15 + $0x50] sm:$0xff]  ;;  %v342_v27 = vld [vmem:[%s1424_s1 + $0x18] sm:$0xff] }
  0x1c   : > { %948 = vmatprep.subr.mxu0 %v351_v4  ;;  %1023 = vmatprep.subr.mxu1 %v351_v4  ;;  %v341_v28 = vld [vmem:[%s1424_s1 + $0x10] sm:$0xff]  ;;  %v242_v29 = vld [vmem:[%s1255_s15 + $0x78] sm:$0xff]  ;;  %v340_v31 = vld [vmem:[%s1424_s1 + $0x8] sm:$0xff] }
  0x1d   : > { %949 = vmatpush3.msra.mxu0 %v351_v4  ;;  %1039 = vmatpush3.msra.mxu1 %v351_v4  ;;  %v241_v30 = vld [vmem:[%s1255_s15 + $0x70] sm:$0xff]  ;;  %v339_v32 = vld [vmem:[%s1424_s1] sm:$0xff]  ;;  %v584_v53 = vld [vmem:[%s1425_s2 + $0x18] sm:$0xff]  ;;  %s216_s15 = sand.u32 1, %s1149_s19  }
  0x1e   : > { %950 = vmatprep.subr.mxu0 %v350_v7  ;;  %1024 = vmatprep.subr.mxu1 %v350_v7  ;;  %v583_v54 = vld [vmem:[%s1425_s2 + $0x10] sm:$0xff]  ;;  %v582_v55 = vld [vmem:[%s1425_s2 + $0x8] sm:$0xff]  ;;  %v581_v56 = vld [vmem:[%s1425_s2] sm:$0xff]  ;;  %s858_s11 = sshll.u32 %s216_s15, 3  ;;  %s782_s30 = scalar_lea.sflag [#allocation3], %s216_s15 }
  0x1f   : > { %253 = vperm.xlu1 %1096, %v230_v8   ;;  %247 = vperm.xlu0 %1095, %v228_v9   ;;  %s218_s16 = scalar_lea.vmem [#allocation2], %s858_s11 }
  0x20   : > { %951 = vmatpush3.msra.mxu0 %v350_v7  ;;  %1040 = vmatpush3.msra.mxu1 %v350_v7  ;;  %s795_s17 = sshll.u32 %s218_s16, 4  ;;  %s796_s17 = int_to_ptr.vmem [resolvable:$true] %s795_s17 }
  0x21   : > { %952 = vmatprep.subr.mxu0 %v349_v10  ;;  %1025 = vmatprep.subr.mxu1 %v349_v10  ;;  %s1097_s6 = scalar_lea.vmem %s796_s17, 128  ;;  %p1104_p0 = scmp.lt.s32.totalorder %s796_s17, %s1102_s7 }
  0x22   : > { %953 = vmatpush3.msra.mxu0 %v349_v10  ;;  %1041 = vmatpush3.msra.mxu1 %v349_v10  ;;  %p1098_p11 = scmp.ne.s32.totalorder %s796_s17, %s1097_s6  ;;  %p1105_p1 = scmp.lt.s32.totalorder %s1103_s8, %s1097_s6 }
  0x23   : > { %259 = vperm.xlu1 %1096, %v232_v11   ;;  %256 = vperm.xlu0 %1095, %v231_v12  }
  0x24   : > { %954 = vmatprep.subr.mxu0 %v348_v13  ;;  %1026 = vmatprep.subr.mxu1 %v348_v13  ;;  %p1099_p12 = pnand %p1098_p11, %p1232_p5  ;;  %p1106_p2 = por %p1105_p1, %p1104_p0 }
  0x25   : > { %955 = vmatpush3.msra.mxu0 %v348_v13  ;;  %1042 = vmatpush3.msra.mxu1 %v348_v13 }
  0x26   : > { %956 = vmatprep.subr.mxu0 %v347_v14  ;;  %1027 = vmatprep.subr.mxu1 %v347_v14  ;;  %p1100_p13 = pneg %p1099_p12 }
  0x27   : > { %265 = vperm.xlu1 %1096, %v234_v15   ;;  %262 = vperm.xlu0 %1095, %v233_v16  }
  0x28   : > { %957 = vmatpush3.msra.mxu0 %v347_v14  ;;  %1043 = vmatpush3.msra.mxu1 %v347_v14  ;;  %p1107_p3 = pnand %p1106_p2, %p1100_p13 }
  0x29   : > { %958 = vmatprep.subr.mxu0 %v346_v17  ;;  %1028 = vmatprep.subr.mxu1 %v346_v17 }
  0x2a   : > { %959 = vmatpush3.msra.mxu0 %v346_v17  ;;  %1044 = vmatpush3.msra.mxu1 %v346_v17 }
  0x2b   : > { %271 = vperm.xlu1 %1096, %v236_v18   ;;  %268 = vperm.xlu0 %1095, %v235_v19  }
  0x2c   : > { %960 = vmatprep.subr.mxu0 %v345_v20  ;;  %1029 = vmatprep.subr.mxu1 %v345_v20 }
  0x2d   : > { %961 = vmatpush3.msra.mxu0 %v345_v20  ;;  %1045 = vmatpush3.msra.mxu1 %v345_v20 }
  0x2e   : > { %962 = vmatprep.subr.mxu0 %v344_v21  ;;  %1030 = vmatprep.subr.mxu1 %v344_v21 }
  0x2f   : > { %283 = vperm.xlu1 %1096, %v240_v22   ;;  %280 = vperm.xlu0 %1095, %v239_v23  }
  0x30   : > { %963 = vmatpush3.msra.mxu0 %v344_v21  ;;  %1046 = vmatpush3.msra.mxu1 %v344_v21 }
  0x31   : > { %964 = vmatprep.subr.mxu0 %v343_v24  ;;  %1031 = vmatprep.subr.mxu1 %v343_v24 }
  0x32   : > { %965 = vmatpush3.msra.mxu0 %v343_v24  ;;  %1047 = vmatpush3.msra.mxu1 %v343_v24 }
  0x33   : > { %277 = vperm.xlu1 %1096, %v238_v25   ;;  %274 = vperm.xlu0 %1095, %v237_v26  }
  0x34   : > { %966 = vmatprep.subr.mxu0 %v342_v27  ;;  %1032 = vmatprep.subr.mxu1 %v342_v27 }
  0x35   : > { %967 = vmatpush3.msra.mxu0 %v342_v27  ;;  %1048 = vmatpush3.msra.mxu1 %v342_v27 }
  0x36   : > { %968 = vmatprep.subr.mxu0 %v341_v28  ;;  %1033 = vmatprep.subr.mxu1 %v341_v28 }
  0x37   : > { %289 = vperm.xlu1 %1096, %v242_v29   ;;  %286 = vperm.xlu0 %1095, %v241_v30  }
  0x38   : > { %969 = vmatpush3.msra.mxu0 %v341_v28  ;;  %1049 = vmatpush3.msra.mxu1 %v341_v28 }
  0x39   : > { %970 = vmatprep.subr.mxu0 %v340_v31  ;;  %1034 = vmatprep.subr.mxu1 %v340_v31 }
  0x3a   : > { %971 = vmatpush3.msra.mxu0 %v340_v31  ;;  %1050 = vmatpush3.msra.mxu1 %v340_v31 }
  0x3b   : > { %972 = vmatprep.subr.mxu0 %v339_v32  ;;  %1035 = vmatprep.subr.mxu1 %v339_v32 }
  0x3c   : > { %973 = vmatpush3.msra.mxu0 %v339_v32  ;;  %1051 = vmatpush3.msra.mxu1 %v339_v32 }
  0x3d   : > { %998 = vmatprep.subr.mxu1 %v1161_v52 }
  0x96   : > { %v251_v35 = vpop.permute.xlu1 %250  ;;  %v245_v36 = vpop.permute.xlu0 %244 }
  0x97   : > { %vm291_vm0 = vcmp.eq.s32.totalorder %v245_v36, %v226_v34  ;;  %vm293_vm2 = vcmp.eq.s32.totalorder %v251_v35, %v226_v34 }
  0x98   : > { %974 = vmatprep.mubr.msk.f32.mxu0 %vm291_vm0, %v1160_v37  ;;  %vm1162_vm0 = vmmov 0  }
  0x9a   : > { %v254_v38 = vpop.permute.xlu1 %253  ;;  %v248_v39 = vpop.permute.xlu0 %247 }
  0x9b   : > { %vm292_vm1 = vcmp.eq.s32.totalorder %v248_v39, %v226_v34  ;;  %vm294_vm3 = vcmp.eq.s32.totalorder %v254_v38, %v226_v34 }
  0x9c   : > { %975 = vmatmul.mubr.msk.f32.vlgmr.msra.gmra.mxu0 %vm292_vm1, %v1160_v37  ;;  %vm500_vm1 = vcmask 261120  }
  0x9d   : > { %977 = vmatprep.mubr.msk.f32.mxu0 %vm293_vm2, %v1160_v37  ;;  %vm593_vm2 = vcmask 1041409  }
  0x9e   : > { %v260_v40 = vpop.permute.xlu1 %259  ;;  %v257_v41 = vpop.permute.xlu0 %256 }
  0x9f   : > { %vm295_vm4 = vcmp.eq.s32.totalorder %v257_v41, %v226_v34  ;;  %vm296_vm5 = vcmp.eq.s32.totalorder %v260_v40, %v226_v34 }
  0xa0   : > { %978 = vmatmul.mubr.msk.f32.gmra.mxu0 %vm294_vm3, %v1160_v37  ;;  %vm595_vm3 = vcmask 1042434  }
  0xa1   : > { %980 = vmatprep.mubr.msk.f32.mxu0 %vm295_vm4, %v1160_v37  ;;  %vm597_vm4 = vcmask 1043459  }
  0xa2   : > { %v266_v42 = vpop.permute.xlu1 %265  ;;  %v263_v43 = vpop.permute.xlu0 %262 }
  0xa3   : > { %vm297_vm6 = vcmp.eq.s32.totalorder %v263_v43, %v226_v34  ;;  %vm298_vm7 = vcmp.eq.s32.totalorder %v266_v42, %v226_v34 }
  0xa4   : > { %981 = vmatmul.mubr.msk.f32.gmra.mxu0 %vm296_vm5, %v1160_v37  ;;  %vm599_vm5 = vcmask 1044484  }
  0xa5   : > { %983 = vmatprep.mubr.msk.f32.mxu0 %vm297_vm6, %v1160_v37  ;;  %vm601_vm6 = vcmask 1045509  }
  0xa6   : > { %v272_v44 = vpop.permute.xlu1 %271  ;;  %v269_v45 = vpop.permute.xlu0 %268 }
  0xa7   : > { %vm299_vm8 = vcmp.eq.s32.totalorder %v269_v45, %v226_v34  ;;  %vm300_vm9 = vcmp.eq.s32.totalorder %v272_v44, %v226_v34 }
  0xa8   : > { %984 = vmatmul.mubr.msk.f32.gmra.mxu0 %vm298_vm7, %v1160_v37  ;;  %vm603_vm7 = vcmask 1046534  }
  0xa9   : > { %986 = vmatprep.mubr.msk.f32.mxu0 %vm299_vm8, %v1160_v37  ;;  %vm605_vm8 = vcmask 1047559  }
  0xaa   : > { %v284_v46 = vpop.permute.xlu1 %283  ;;  %v281_v47 = vpop.permute.xlu0 %280 }
  0xab   : > { %vm304_vm10 = vcmp.eq.s32.totalorder %v284_v46, %v226_v34  ;;  %vm303_vm11 = vcmp.eq.s32.totalorder %v281_v47, %v226_v34 }
  0xac   : > { %987 = vmatmul.mubr.msk.f32.gmra.mxu0 %vm300_vm9, %v1160_v37  ;;  %992 = vmatprep.mubr.msk.f32.mxu1 %vm303_vm11, %v1160_v37 }
  0xad   : > { %993 = vmatmul.mubr.msk.f32.vlgmr.msra.gmra.mxu1 %vm304_vm10, %v1160_v37 }
  0xae   : > { %v278_v48 = vpop.permute.xlu1 %277  ;;  %v275_v49 = vpop.permute.xlu0 %274  ;;  %999 = vmatpush3.msra.mxu1 %v584_v53 }
  0xaf   : > { %vm302_vm12 = vcmp.eq.s32.totalorder %v278_v48, %v226_v34  ;;  %vm301_vm13 = vcmp.eq.s32.totalorder %v275_v49, %v226_v34  ;;  %1000 = vmatprep.subr.mxu1 %v1161_v52 }
  0xb0   : > { %989 = vmatprep.mubr.msk.f32.mxu0 %vm301_vm13, %v1160_v37  ;;  %1001 = vmatpush3.msra.mxu1 %v583_v54 }
  0xb1   : > { %990 = vmatmul.mubr.msk.f32.gmra.mxu0 %vm302_vm12, %v1160_v37  ;;  %1002 = vmatprep.subr.mxu1 %v1161_v52 }
  0xb2   : > { %v290_v50 = vpop.permute.xlu1 %289  ;;  %v287_v51 = vpop.permute.xlu0 %286  ;;  %1003 = vmatpush3.msra.mxu1 %v582_v55 }
  0xb3   : > { %vm306_vm14 = vcmp.eq.s32.totalorder %v290_v50, %v226_v34  ;;  %vm305_vm15 = vcmp.eq.s32.totalorder %v287_v51, %v226_v34  ;;  %1004 = vmatprep.subr.mxu1 %v1161_v52 }
  0xb4   : > { %995 = vmatprep.mubr.msk.f32.mxu1 %vm305_vm15, %v1160_v37  ;;  %1005 = vmatpush3.msra.mxu1 %v581_v56 }
  0xb5   : > { %996 = vmatmul.mubr.msk.f32.gmra.mxu1 %vm306_vm14, %v1160_v37  ;;  %1009 = vmatprep.subr.mxu1 %v1161_v52 }
  0xb6   : > { %1006 = vmatprep.mubr.msk.f32.mxu1 %vm1162_vm0, %v1161_v52 }
 0x15c   : > { %v976_v57 = vpop.f32.mrf.mxu0 }
 0x15d   : > { %v502_v62 = vsel %vm500_vm1, %v976_v57, -inf }
 0x15e   : > { %v421_v58 = vpop.f32.mrf.mxu0 }
 0x15f   : > { %v501_v60 = vsel %vm500_vm1, %v421_v58, -inf }
 0x160   : > { %v979_v59 = vpop.f32.mrf.mxu0  ;;  %v503_v1 = vmax.f32 %v501_v60, %v502_v62 }
 0x161   : > { %v511_v63 = vsel %vm500_vm1, %v979_v59, -inf }
 0x162   : > { %v431_v61 = vpop.f32.mrf.mxu0  ;;  %v504_v8 = vrot.slane %v503_v1, 4 }
 0x163   : > { %v510_v0 = vsel %vm500_vm1, %v431_v61, -inf }
 0x164   : > { %v512_v2 = vmax.f32 %v510_v0, %v511_v63  ;;  %v982_v3 = vpop.f32.mrf.mxu0  ;;  %v505_v16 = vmax.f32 %v503_v1, %v504_v8 }
 0x165   : > { %v520_v6 = vsel %vm500_vm1, %v982_v3, -inf }
 0x166   : > { %v513_v4 = vrot.slane %v512_v2, 4  ;;  %v441_v5 = vpop.f32.mrf.mxu0  ;;  %v506_v28 = vrot.slane %v505_v16, 2 }
 0x167   : > { %v519_v7 = vsel %vm500_vm1, %v441_v5, -inf }
 0x168   : > { %v521_v9 = vmax.f32 %v519_v7, %v520_v6  ;;  %v985_v10 = vpop.f32.mrf.mxu0  ;;  %v514_v11 = vmax.f32 %v512_v2, %v513_v4  ;;  %v507_v40 = vmax.f32 %v505_v16, %v506_v28 }
 0x169   : > { %v529_v14 = vsel %vm500_vm1, %v985_v10, -inf }
 0x16a   : > { %v522_v12 = vrot.slane %v521_v9, 4  ;;  %v451_v13 = vpop.f32.mrf.mxu0  ;;  %v515_v21 = vrot.slane %v514_v11, 2  ;;  %v508_v55 = vrot.slane %v507_v40, 1 }
 0x16b   : > { %v528_v15 = vsel %vm500_vm1, %v451_v13, -inf }
 0x16c   : > { %v523_v17 = vmax.f32 %v521_v9, %v522_v12  ;;  %v530_v18 = vmax.f32 %v528_v15, %v529_v14  ;;  %v988_v19 = vpop.f32.mrf.mxu0  ;;  %v516_v33 = vmax.f32 %v514_v11, %v515_v21  ;;  %v509_v5 = vmax.f32 %v507_v40, %v508_v55 }
 0x16d   : > { %v994_v20 = vpop.f32.mrf.mxu1  ;;  %v538_v25 = vsel %vm500_vm1, %v988_v19, -inf }
 0x16e   : > { %v524_v22 = vrot.slane %v523_v17, 2  ;;  %v531_v23 = vrot.slane %v530_v18, 4  ;;  %v461_v24 = vpop.f32.mrf.mxu0  ;;  %v556_v36 = vsel %vm500_vm1, %v994_v20, -inf  ;;  %v517_v48 = vrot.slane %v516_v33, 1 }
 0x16f   : > { %v537_v26 = vsel %vm500_vm1, %v461_v24, -inf  ;;  %v481_v27 = vpop.f32.mrf.mxu1  ;;  %v573_v14 = vmul.f32 %v509_v5, %v509_v5 }
 0x170   : > { %v532_v29 = vmax.f32 %v530_v18, %v531_v23  ;;  %v539_v30 = vmax.f32 %v537_v26, %v538_v25  ;;  %v555_v31 = vsel %vm500_vm1, %v481_v27, -inf  ;;  %v525_v34 = vmax.f32 %v523_v17, %v524_v22 }
 0x171   : > { %v991_v32 = vpop.f32.mrf.mxu0  ;;  %v557_v38 = vmax.f32 %v555_v31, %v556_v36  ;;  %v518_v63 = vmax.f32 %v516_v33, %v517_v48  ;;  %v681_v36 = vld [vmem:[%s1426_s3 + $0x10] sm:$0xff] }
 0x172   : > { %v533_v35 = vrot.slane %v532_v29, 2  ;;  %v540_v37 = vrot.slane %v539_v30, 4  ;;  %v547_v42 = vsel %vm500_vm1, %v991_v32, -inf  ;;  %v526_v49 = vrot.slane %v525_v34, 1  ;;  %v682_v32 = vld [vmem:[%s1426_s3 + $0x18] sm:$0xff] }
 0x173   : > { %v471_v39 = vpop.f32.mrf.mxu0  ;;  %v558_v45 = vrot.slane %v557_v38, 4  ;;  %v574_v10 = vmul.f32 %v518_v63, %v518_v63  ;;  %v691_v33 = vsel %vm593_vm2, %v518_v63, %v509_v5 }
 0x174   : > { %v534_v41 = vmax.f32 %v532_v29, %v533_v35  ;;  %v546_v43 = vsel %vm500_vm1, %v471_v39, -inf  ;;  %v541_v44 = vmax.f32 %v539_v30, %v540_v37  ;;  %v527_v0 = vmax.f32 %v525_v34, %v526_v49  ;;  %v680_v39 = vld [vmem:[%s1426_s3 + $0x8] sm:$0xff] }
 0x175   : > { %v548_v46 = vmax.f32 %v546_v43, %v547_v42  ;;  %v997_v47 = vpop.f32.mrf.mxu1  ;;  %v559_v51 = vmax.f32 %v557_v38, %v558_v45  ;;  %v594_v19 = vsel %vm593_vm2, %v574_v10, %v573_v14 }
 0x176   : > { %v542_v50 = vrot.slane %v541_v44, 2  ;;  %v535_v56 = vrot.slane %v534_v41, 1  ;;  %v565_v57 = vsel %vm500_vm1, %v997_v47, -inf  ;;  %v575_v11 = vmul.f32 %v527_v0, %v527_v0  ;;  %v895_v47 = vld [vmem:[%s1427_s4] ss:$0 sm:$0xff] }
 0x177   : > { %v549_v53 = vrot.slane %v548_v46, 4  ;;  %v491_v54 = vpop.f32.mrf.mxu1  ;;  %v560_v60 = vrot.slane %v559_v51, 2  ;;  %v692_v35 = vsel %vm595_vm3, %v527_v0, %v691_v33 }
 0x178   : > { %v564_v58 = vsel %vm500_vm1, %v491_v54, -inf  ;;  %v543_v59 = vmax.f32 %v541_v44, %v542_v50  ;;  %v536_v6 = vmax.f32 %v534_v41, %v535_v56  ;;  %v596_v21 = vsel %vm595_vm3, %v575_v11, %v594_v19  ;;  %v679_v41 = vld [vmem:[%s1426_s3] sm:$0xff] }
 0x179   : > { %v550_v61 = vmax.f32 %v548_v46, %v549_v53  ;;  %v566_v62 = vmax.f32 %v564_v58, %v565_v57  ;;  %v561_v2 = vmax.f32 %v559_v51, %v560_v60 }
 0x17a   : > { %v544_v1 = vrot.slane %v543_v59, 1  ;;  %v576_v15 = vmul.f32 %v536_v6, %v536_v6  ;;  %v693_v37 = vsel %vm597_vm4, %v536_v6, %v692_v35 }
 0x17b   : > { %v551_v3 = vrot.slane %v550_v61, 2  ;;  %v567_v4 = vrot.slane %v566_v62, 4  ;;  %v562_v12 = vrot.slane %v561_v2, 1 }
 0x17c   : > { %v545_v7 = vmax.f32 %v543_v59, %v544_v1  ;;  %v598_v24 = vsel %vm597_vm4, %v576_v15, %v596_v21 }
 0x17d   : > { %v552_v8 = vmax.f32 %v550_v61, %v551_v3  ;;  %v568_v9 = vmax.f32 %v566_v62, %v567_v4  ;;  %v563_v22 = vmax.f32 %v561_v2, %v562_v12 }
 0x17e   : > { %v577_v17 = vmul.f32 %v545_v7, %v545_v7  ;;  %v694_v38 = vsel %vm599_vm5, %v545_v7, %v693_v37 }
 0x17f   : > { %v553_v13 = vrot.slane %v552_v8, 1  ;;  %v569_v16 = vrot.slane %v568_v9, 2  ;;  %v579_v29 = vmul.f32 %v563_v22, %v563_v22 }
 0x180   : > { %v600_v26 = vsel %vm599_vm5, %v577_v17, %v598_v24 }
 0x181   : > { %v554_v18 = vmax.f32 %v552_v8, %v553_v13  ;;  %v570_v20 = vmax.f32 %v568_v9, %v569_v16 }
 0x183   : > { %v578_v23 = vmul.f32 %v554_v18, %v554_v18  ;;  %v571_v25 = vrot.slane %v570_v20, 1  ;;  %v695_v40 = vsel %vm601_vm6, %v554_v18, %v694_v38 }
 0x184   : > { %v696_v42 = vsel %vm603_vm7, %v563_v22, %v695_v40 }
 0x185   : > { %v572_v27 = vmax.f32 %v570_v20, %v571_v25  ;;  %v602_v28 = vsel %vm601_vm6, %v578_v23, %v600_v26 }
 0x186   : > { %v604_v31 = vsel %vm603_vm7, %v579_v29, %v602_v28 }
 0x187   : > { %v580_v30 = vmul.f32 %v572_v27, %v572_v27  ;;  %v697_v43 = vsel %vm605_vm8, %v572_v27, %v696_v42 }
 0x189   : > { %v606_v34 = vsel %vm605_vm8, %v580_v30, %v604_v31 }
 0x18a   : > { %1007 = vmatmul.mubr.msk.f32.vlgmr.msra.gmra.mxu1 %vm500_vm1, %v606_v34 }
 0x18b   : > { %1010 = vmatpush3.msra.mxu1 %v682_v32  ;;  %1017 = vmatprep.mubr.msk.f32.mxu1 %vm1162_vm0, %v1161_v52 }
 0x18c   : > { %1011 = vmatprep.subr.mxu1 %v1161_v52 }
 0x18d   : > { %1012 = vmatpush3.msra.mxu1 %v681_v36 }
 0x18e   : > { %1013 = vmatprep.subr.mxu1 %v1161_v52 }
 0x18f   : > { %1014 = vmatpush3.msra.mxu1 %v680_v39 }
 0x190   : > { %1015 = vmatprep.subr.mxu1 %v1161_v52 }
 0x191   : > { %1016 = vmatpush3.msra.mxu1 %v679_v41 }
 0x192   : > { %1018 = vmatmul.mubr.msk.f32.vlgmr.msra.gmra.mxu1 %vm500_vm1, %v697_v43 }
 0x24a   : > { %v675_v44 = vpop.f32.mrf.mxu1 }
 0x24b   : > { %v771_v46 = vmul.f32 0.5, %v675_v44 }
 0x24c   : > { %v1008_v45 = vpop.f32.mrf.mxu1 }
 0x24d   : > { %v778_v52 = vsub.f32 %v895_v47, %v771_v46 }
 0x252   : > { %v766_v48 = vpop.f32.mrf.mxu1 }
 0x253   : > { %v779_v49 = vadd.f32 %v778_v52, %v766_v48 }
 0x254   : > { %v1019_v50 = vpop.f32.mrf.mxu1 }
 0x255   : > { %780 = vst [vmem:[%s218_s16] sm:$0xff] %v779_v49 }
 0x256   : > { %1110 = shalt.err (!%p1107_p3)
}
 0x257   : > { %s1111_s9 = scalar_lea.hbm %s1388_s26, 128  ;;  %s1115_s11 = scalar_lea.hbm %s1428_s5, 256 }
 0x258   : > { %p1112_p4 = scmp.ne.s32.totalorder %s1388_s26, %s1111_s9  ;;  %p1116_p9 = scmp.lt.s32.totalorder %s1388_s26, %s1428_s5 }
 0x259   : > { %p1117_p10 = scmp.lt.s32.totalorder %s1115_s11, %s1111_s9 }
 0x25a   : > { %p1113_p7 = pnand %p1112_p4, %p1232_p5 }
 0x25b   : > { %p1118_p11 = por %p1117_p10, %p1116_p9 }
 0x25c   : > { %p1114_p8 = pneg %p1113_p7 }
 0x25e   : > { %p1119_p12 = pnand %p1118_p11, %p1114_p8 }
 0x260   : > { %1122 = shalt.err (!%p1119_p12)
}
 0x261   : > { %1052 = dma.vmem_to_hbm [thread:$0]  (%p1232_p5), %s796_s17, 128, %s1388_s26, %s782_s30  }
 0x262 PF: > { %p1058_p13 = scmp.ge.s32.totalorder %s1157_s21, 2  ;;  %s807_s14 = sand.u32 1, %s1145_s18  }
 0x263   : > { %s808_s16 = scalar_lea.sflag [#allocation3], %s807_s14 }
 0x264   : > { %p1055_p0 = pnand %p1058_p13, %p1236_p6 }
 0x266   : > { %p1056_p1 = pneg %p1055_p0 }
 0x268   : > { %1140 = dma.done.wait (%p1056_p1), %s808_s16, 128  }
 0x269   : > { %1142 = vsyncadd (%p1056_p1), %s808_s16, 4294967168  ;;  %p15_p2 = scmp.ge.s32.totalorder %s1219_s24, 4   ;;  %s1431_s18 = smov %s1149_s19 }
 0x26a   : > { %s1432_s19 = smov %s1153_s20  ;;  %s1433_s20 = smov %s1230_s27 }
 0x26b   : > { %s1434_s21 = smov %s1219_s24  ;;  %17 = sbr.rel (!%p15_p2) target bundleno = 3 (0x3), region = 75 }
 0x270   :  { %813 = vsyncpa [#allocation3], 1 }
 0x271   :  { %815 = vsyncpa [#allocation3 + $0x1], 1 }

</bundles_post_ra>
